<compile_context>
chip_gen: v6e
topology: v6e:2x2x1
jax: 0.10.0
libtpu: 0.0.40
codegen_flags: <defaults>
</compile_context>

<pallas_src>
import functools

import jax
import jax.numpy as jnp
from jax.experimental import pallas as pl
from jax.experimental.pallas import tpu as pltpu

K = 28 * 28          # input features
N_CLASSES = 10
N_PAD = 128          # lane-dense padded class dimension


def _netlin_kernel(x_ref, w_ref, o_ref, *, n_valid):
    """One batch tile of Linear(784 -> 128-padded) + resident-logits log_softmax(dim=0).

    x_ref: [TB, 784] bf16          w_ref: [784, 128] bf16 (cols >= 10 are zero)
    o_ref: [B_pad, 128] f32        resident across the whole grid (constant index_map)
    """
    i = pl.program_id(0)
    tb = x_ref.shape[0]
    start = pl.multiple_of(i * tb, tb)

    # MXU matmul, bf16 operands, f32 accumulate.
    logits = jnp.dot(x_ref[...], w_ref[...], preferred_element_type=jnp.float32)
    o_ref[pl.ds(start, tb), :] = logits

    @pl.when(i == pl.num_programs(0) - 1)
    def _finalize():
        all_logits = o_ref[...]
        # Mask padded batch rows so they cannot influence the dim=0 reduction.
        row = jax.lax.broadcasted_iota(jnp.int32, all_logits.shape, 0)
        masked = jnp.where(row < n_valid, all_logits, -jnp.inf)
        m = jnp.max(masked, axis=0, keepdims=True)
        z = masked - m
        lse = jnp.log(jnp.sum(jnp.exp(z), axis=0, keepdims=True))
        o_ref[...] = z - lse            # padded rows become -inf; sliced off on host


def _pick_tile(batch):
    if batch >= 1024:
        # 2 buffers * 1024 * 784 * 2B ≈ 3.2 MB of live x tiles: safe on v7x's 64 MiB VMEM.
        return 1024
    # Round tiny batches up to the bf16 sublane granularity.
    return max(16, ((batch + 15) // 16) * 16)


@jax.jit
def netlin_forward(x, params):
    """x: any shape with 28*28 trailing elements per sample (e.g. NCHW MNIST)."""
    w_pad, _b = params          # bias is a provable no-op under log_softmax(dim=0); not sent to the kernel
    batch = x.shape[0]
    x_flat = x.reshape(batch, K).astype(jnp.bfloat16)   # halve the dominant HBM stream

    tb = _pick_tile(batch)
    b_pad = pl.cdiv(batch, tb) * tb
    if b_pad != batch:
        # TODO(synk): for large, misaligned B this host-side pad costs one extra copy of x;
        # relying on Pallas ragged-edge blocks (grid=cdiv, no pad) would avoid it.
        x_flat = jnp.pad(x_flat, ((0, b_pad - batch), (0, 0)))

    grid = (b_pad // tb,)
    kernel = functools.partial(_netlin_kernel, n_valid=batch)

    compiler_kwargs = dict(dimension_semantics=("arbitrary",))  # grid axis = softmax reduction axis
    vmem_needed = 2 * tb * K * 2 + K * N_PAD * 2 + 2 * b_pad * N_PAD * 4 + (2 << 20)
    if vmem_needed > (16 << 20):
        # Only raise the scoped VMEM limit above the smallest default (v5e: 16 MiB) when required.
        compiler_kwargs["vmem_limit_bytes"] = vmem_needed

    out = pl.pallas_call(
        kernel,
        out_shape=jax.ShapeDtypeStruct((b_pad, N_PAD), jnp.float32),
        grid_spec=pltpu.PrefetchScalarGridSpec(
            num_scalar_prefetch=0,
            grid=grid,
            in_specs=[
                pl.BlockSpec((tb, K), lambda i: (i, 0)),        # x: streamed, double-buffered
                pl.BlockSpec((K, N_PAD), lambda i: (0, 0)),     # w: resident (≈200 KB bf16)
            ],
            out_specs=pl.BlockSpec((b_pad, N_PAD), lambda i: (0, 0)),  # logits resident across grid
        ),
        compiler_params=pltpu.CompilerParams(**compiler_kwargs),
    )(x_flat, w_pad)

    return out[:batch, :N_CLASSES]


def init_params(key):
    """Weight stored pre-transposed [in, out], zero-padded to 128 classes, bf16."""
    kw, kb = jax.random.split(key)
    w = 0.05 * jax.random.normal(kw, (K, N_CLASSES), jnp.float32)
    b = 0.05 * jax.random.normal(kb, (N_CLASSES,), jnp.float32)
    w_pad = jnp.zeros((K, N_PAD), jnp.bfloat16).at[:, :N_CLASSES].set(w.astype(jnp.bfloat16))
    return (w_pad, b)


def reference_forward(x, params):
    """Pure-JAX reference mirroring the PyTorch forward (Linear + bias, log_softmax dim=0)."""
    w_pad, b = params
    w = w_pad[:, :N_CLASSES].astype(jnp.float32)
    y = x.reshape(x.shape[0], -1) @ w + b
    return jax.nn.log_softmax(y, axis=0)    # dim=0, exactly as in the original module


if __name__ == "__main__":
    key = jax.random.PRNGKey(0)
    kx, kp = jax.random.split(key)
    # NCHW input like MNIST (1 channel, 28x28), small batch.
    x = jax.random.normal(kx, (2, 1, 28, 28), jnp.float32)
    params = init_params(kp)

    out = jax.block_until_ready(netlin_forward(x, params))
    ref = reference_forward(x, params)

    assert out.shape == (2, 10)
    # bf16 x stream in the kernel (f32 accumulate) -> ~1e-2-level deviation from the f32 reference.
    if not jnp.allclose(out, ref, rtol=2e-2, atol=2e-2):
        raise AssertionError("Pallas output does not match JAX reference")
    print("KERNEL_OK")
</pallas_src>

<mosaic_0001>
module attributes {stable_mosaic.version = 11 : i64} {
  func.func @_netlin_kernel(%arg0: i32, %arg1: memref<16x784xbf16, #tpu.memory_space<vmem>>, %arg2: memref<784x128xbf16, #tpu.memory_space<vmem>>, %arg3: memref<16x128xf32, #tpu.memory_space<vmem>>) attributes {dimension_semantics = [#tpu.dimension_semantics<arbitrary>], iteration_bounds = array<i64: 1>, scalar_prefetch = 0 : i64, scratch_operands = 0 : i64, tpu.core_type = #tpu.core_type<tc>, window_params = [{transform_indices = @transform_0, window_bounds = array<i64: 16, 784>}, {pipeline_mode = #tpu.pipeline_mode<synchronous>, transform_indices = @transform_1, window_bounds = array<i64: 784, 128>}, {pipeline_mode = #tpu.pipeline_mode<synchronous>, transform_indices = @transform_2, window_bounds = array<i64: 16, 128>}]} {
    %c16_i32 = arith.constant 16 : i32
    %0 = arith.muli %arg0, %c16_i32 : i32
    %1 = tpu.assume_multiple %0, 16 : i32
    %c0 = arith.constant 0 : index
    %c0_0 = arith.constant 0 : index
    %2 = vector.load %arg1[%c0, %c0_0] : memref<16x784xbf16, #tpu.memory_space<vmem>>, vector<16x784xbf16>
    %c0_1 = arith.constant 0 : index
    %c0_2 = arith.constant 0 : index
    %3 = vector.load %arg2[%c0_1, %c0_2] : memref<784x128xbf16, #tpu.memory_space<vmem>>, vector<784x128xbf16>
    %cst = arith.constant dense<0.000000e+00> : vector<16x128xf32>
    %4 = tpu.matmul %2, %3, %cst {dimension_numbers = #tpu.dot_dimension_numbers<[1], [0], [0], [1], [0, 0, 1, 1], [], []>} : vector<16x784xbf16>, vector<784x128xbf16>, vector<16x128xf32> -> vector<16x128xf32>
    %5 = arith.index_cast %1 : i32 to index
    %c0_3 = arith.constant 0 : index
    %6 = vector.load %arg3[%5, %c0_3] : memref<16x128xf32, #tpu.memory_space<vmem>>, vector<16x128xf32>
    tpu.vector_store %arg3[%5, %c0_3], %4 {strides = array<i32>} : memref<16x128xf32, #tpu.memory_space<vmem>>, vector<16x128xf32>,
    %c0_i32 = arith.constant 0 : i32
    %7 = arith.cmpi eq, %arg0, %c0_i32 : i32
    %8 = arith.extui %7 : i1 to i32
    %c0_i32_4 = arith.constant 0 : i32
    %9 = arith.cmpi ne, %8, %c0_i32_4 : i32
    scf.if %9 {
      %c0_5 = arith.constant 0 : index
      %c0_6 = arith.constant 0 : index
      %10 = vector.load %arg3[%c0_5, %c0_6] : memref<16x128xf32, #tpu.memory_space<vmem>>, vector<16x128xf32>
      %11 = tpu.iota {dimensions = array<i32: 0>} : vector<16x128xi32>
      %c2_i32 = arith.constant 2 : i32
      %12 = vector.broadcast %c2_i32 : i32 to vector<16x128xi32>
      %13 = arith.cmpi slt, %11, %12 : vector<16x128xi32>
      %cst_7 = arith.constant 0xFF800000 : f32
      %14 = vector.broadcast %cst_7 : f32 to vector<16x128xf32>
      %15 = arith.select %13, %10, %14 : vector<16x128xi1>, vector<16x128xf32>
      %cst_8 = arith.constant dense<0xFF800000> : vector<128xf32>
      %16 = vector.multi_reduction <maximumf>, %15, %cst_8 [0] : vector<16x128xf32> to vector<128xf32>
      %17 = vector.shape_cast %16 : vector<128xf32> to vector<1x128xf32>
      %18 = vector.broadcast %17 : vector<1x128xf32> to vector<16x128xf32>
      %19 = arith.subf %15, %18 : vector<16x128xf32>
      %20 = math.exp %19 : vector<16x128xf32>
      %cst_9 = arith.constant dense<0.000000e+00> : vector<128xf32>
      %21 = vector.multi_reduction <add>, %20, %cst_9 [0] : vector<16x128xf32> to vector<128xf32>
      %22 = vector.shape_cast %21 : vector<128xf32> to vector<1x128xf32>
      %23 = math.log %22 : vector<1x128xf32>
      %24 = vector.broadcast %23 : vector<1x128xf32> to vector<16x128xf32>
      %25 = arith.subf %19, %24 : vector<16x128xf32>
      %c0_10 = arith.constant 0 : index
      %c0_11 = arith.constant 0 : index
      %26 = vector.load %arg3[%c0_10, %c0_11] : memref<16x128xf32, #tpu.memory_space<vmem>>, vector<16x128xf32>
      tpu.vector_store %arg3[%c0_10, %c0_11], %25 {strides = array<i32>} : memref<16x128xf32, #tpu.memory_space<vmem>>, vector<16x128xf32>,
    } else {
    }
    return
  }
  func.func @transform_0(%arg0: i32) -> (i32, i32) {
    %c0_i32 = arith.constant 0 : i32
    %c0_i32_0 = arith.constant 0 : i32
    return %arg0, %c0_i32 : i32, i32
  }
  func.func @transform_1(%arg0: i32) -> (i32, i32) {
    %c0_i32 = arith.constant 0 : i32
    %c0_i32_0 = arith.constant 0 : i32
    %c0_i32_1 = arith.constant 0 : i32
    return %c0_i32, %c0_i32_0 : i32, i32
  }
  func.func @transform_2(%arg0: i32) -> (i32, i32) {
    %c0_i32 = arith.constant 0 : i32
    %c0_i32_0 = arith.constant 0 : i32
    %c0_i32_1 = arith.constant 0 : i32
    return %c0_i32, %c0_i32_0 : i32, i32
  }
}

</mosaic_0001>

<bundles_post_ra>
// kernel: netlin_forward.1
= control target key start
LH: loop header
LB: loop body
LE: loop exit
PB: predicated region body
PF: predicated region fallthrough
CT: control target
= control target key end

     0   :  { %7 = vsyncpa [#allocation3], 0  ;;  %s900_s9 = smov [#allocation2]   ;;  %s950_s0 = inlined_call_operand.vmem [shape: bf16[16,784], index: 0, kind: input, shape index: {}]   ;;  %s951_s1 = inlined_call_operand.hbm [shape: bf16[784,128], index: 1, kind: input, shape index: {}]   ;;  %s952_s2 = inlined_call_operand.vmem [shape: f32[16,128], index: 2, kind: output, shape index: {}]  }
   0x1   :  { %s15_s10 = sshll.u32 %s900_s9, 4  ;;  %s16_s10 = int_to_ptr.vmem [resolvable:$true] %s15_s10 }
   0x2   :  { %s886_s11 = scalar_lea.vmem %s16_s10, 6272  ;;  %p891_p1 = scmp.lt.s32.totalorder %s16_s10, %s16_s10 }
   0x3   :  { %p887_p0 = scmp.ne.s32.totalorder %s16_s10, %s886_s11  ;;  %p892_p2 = scmp.lt.s32.totalorder %s886_s11, %s886_s11 }
   0x5   :  { %p893_p3 = por %p892_p2, %p891_p1 }
   0x7   :  { %p894_p4 = pnand %p893_p3, %p887_p0 }
   0x9   :  { %897 = shalt.err (!%p894_p4)
}
   0xa   :  { %s901_s12 = smov 64   ;;  %s902_s13 = smov 4  }
   0xb   :  { %21 = dma.hbm_to_vmem [thread:$0]  %s951_s1, 6272, %s16_s10, [#allocation3], %s901_s12, %s901_s12, %s902_s13  }
   0xc   :  { %898 = dma.done.wait [#allocation3], 6272  }
   0xd   :  { %899 = vsyncadd [#allocation3], 4294961024  ;;  %v813_v0 = vld [vmem:[#allocation2 + $0x78] sm:$0xff]   ;;  %v817_v4 = vld [vmem:[#allocation2 + $0x70] sm:$0xff]   ;;  %v903_v36 = vmov 0.0   ;;  %vm904_vm0 = vmmov 0  }
   0xe   :  { %v814_v1 = vld [vmem:[#allocation2 + $0xf8] sm:$0xff]   ;;  %734 = vmatprep.subr.bf16.mxu0 %v813_v0  ;;  %v818_v5 = vld [vmem:[#allocation2 + $0xf0] sm:$0xff]   ;;  %v821_v8 = vld [vmem:[#allocation2 + $0x68] sm:$0xff]   ;;  %vm462_vm1 = vcmask 130048  }
   0xf   :  { %v815_v2 = vld [vmem:[#allocation2 + $0x38] sm:$0xff]   ;;  %756 = vmatprep.subr.bf16.mxu1 %v814_v1  ;;  %v819_v6 = vld [vmem:[#allocation2 + $0x30] sm:$0xff]   ;;  %v822_v9 = vld [vmem:[#allocation2 + $0xe8] sm:$0xff]  }
  0x10   :  { %v816_v3 = vld [vmem:[#allocation2 + $0xb8] sm:$0xff]   ;;  %735 = vmatpush3.bf16.msra.mxu0 %v815_v2  ;;  %v820_v7 = vld [vmem:[#allocation2 + $0xb0] sm:$0xff]   ;;  %v823_v10 = vld [vmem:[#allocation2 + $0x28] sm:$0xff]  }
  0x11   :  { %757 = vmatpush3.bf16.msra.mxu1 %v816_v3  ;;  %736 = vmatprep.subr.bf16.mxu0 %v817_v4  ;;  %v824_v11 = vld [vmem:[#allocation2 + $0xa8] sm:$0xff]   ;;  %v825_v12 = vld [vmem:[#allocation2 + $0x60] sm:$0xff]   ;;  %v829_v16 = vld [vmem:[#allocation2 + $0x58] sm:$0xff]  }
  0x12   :  { %758 = vmatprep.subr.bf16.mxu1 %v818_v5  ;;  %v826_v13 = vld [vmem:[#allocation2 + $0xe0] sm:$0xff]   ;;  %v830_v17 = vld [vmem:[#allocation2 + $0xd8] sm:$0xff]   ;;  %v833_v20 = vld [vmem:[#allocation2 + $0x50] sm:$0xff]   ;;  %v639_v5 = vlaneseq }
  0x13   :  { %v827_v14 = vld [vmem:[#allocation2 + $0x20] sm:$0xff]   ;;  %v831_v18 = vld [vmem:[#allocation2 + $0x18] sm:$0xff]   ;;  %v834_v21 = vld [vmem:[#allocation2 + $0xd0] sm:$0xff]  }
  0x14   :  { %737 = vmatpush3.bf16.msra.mxu0 %v819_v6  ;;  %v828_v15 = vld [vmem:[#allocation2 + $0xa0] sm:$0xff]   ;;  %v832_v19 = vld [vmem:[#allocation2 + $0x98] sm:$0xff]   ;;  %v835_v22 = vld [vmem:[#allocation2 + $0x10] sm:$0xff]  }
  0x15   :  { %759 = vmatpush3.bf16.msra.mxu1 %v820_v7  ;;  %738 = vmatprep.subr.bf16.mxu0 %v821_v8  ;;  %v836_v23 = vld [vmem:[#allocation2 + $0x90] sm:$0xff]   ;;  %v837_v24 = vld [vmem:[#allocation2 + $0x48] sm:$0xff]   ;;  %v841_v28 = vld [vmem:[#allocation2 + $0x40] sm:$0xff]  }
  0x16   :  { %760 = vmatprep.subr.bf16.mxu1 %v822_v9  ;;  %v838_v25 = vld [vmem:[#allocation2 + $0xc8] sm:$0xff]   ;;  %v842_v29 = vld [vmem:[#allocation2 + $0xc0] sm:$0xff]   ;;  %v851_v37 = vld [vmem:[#allocation2 + $0x178] sm:$0xff]  }
  0x17   :  { %v839_v26 = vld [vmem:[#allocation2 + $0x8] sm:$0xff]   ;;  %v843_v30 = vld [vmem:[#allocation2] sm:$0xff]   ;;  %v852_v38 = vld [vmem:[#allocation2 + $0x138] sm:$0xff]  }
  0x18   :  { %739 = vmatpush3.bf16.msra.mxu0 %v823_v10  ;;  %v840_v27 = vld [vmem:[#allocation2 + $0x88] sm:$0xff]   ;;  %v844_v31 = vld [vmem:[#allocation2 + $0x80] sm:$0xff]   ;;  %v853_v39 = vld [vmem:[#allocation2 + $0x170] sm:$0xff]   ;;  %v640_v10 = vshrl.u32 %v639_v5, 7 }
  0x19   :  { %761 = vmatpush3.bf16.msra.mxu1 %v824_v11  ;;  %740 = vmatprep.subr.bf16.mxu0 %v825_v12  ;;  %v845_v32 = vld [vmem:[%s950_s0] ss:$28 sps:$4 sm:$0xff]   ;;  %v848_v34 = vld [vmem:[%s950_s0 + $0x8] ss:$28 sps:$4 sm:$0xff]   ;;  %v854_v40 = vld [vmem:[#allocation2 + $0x130] sm:$0xff]  }
  0x1a   :  { %762 = vmatprep.subr.bf16.mxu1 %v826_v13  ;;  %v847_v33 = vld [vmem:[%s950_s0 + $0x4] ss:$28 sps:$4 sm:$0xff]   ;;  %v850_v35 = vld [vmem:[%s950_s0 + $0xc] ss:$28 sps:$4 sm:$0xff]   ;;  %v859_v45 = vld [vmem:[#allocation2 + $0x158] sm:$0xff]   ;;  %vm642_vm2 = vcmp.lt.s32.totalorder %v640_v10, 2 }
  0x1b   :  { %498 = vmatprep.mubr.bf16.mxu0 %v847_v33  ;;  %539 = vmatprep.mubr.bf16.mxu1 %v850_v35  ;;  %v855_v41 = vld [vmem:[#allocation2 + $0x168] sm:$0xff]   ;;  %v857_v43 = vld [vmem:[#allocation2 + $0x160] sm:$0xff]   ;;  %v860_v46 = vld [vmem:[#allocation2 + $0x118] sm:$0xff]  }
  0x1c   :  { %741 = vmatpush3.bf16.msra.mxu0 %v827_v14  ;;  %v856_v42 = vld [vmem:[#allocation2 + $0x128] sm:$0xff]   ;;  %v858_v44 = vld [vmem:[#allocation2 + $0x120] sm:$0xff]   ;;  %v861_v47 = vld [vmem:[#allocation2 + $0x150] sm:$0xff]  }
  0x1d   :  { %763 = vmatpush3.bf16.msra.mxu1 %v828_v15  ;;  %742 = vmatprep.subr.bf16.mxu0 %v829_v16  ;;  %v867_v48 = vld [vmem:[#allocation2 + $0x180] sm:$0xff]   ;;  %v870_v49 = vld [vmem:[%s950_s0 + $0x14] ss:$28 sps:$4 sm:$0xff]   ;;  %v863_v52 = vld [vmem:[#allocation2 + $0x148] sm:$0xff]  }
  0x1e   :  { %764 = vmatprep.subr.bf16.mxu1 %v830_v17  ;;  %v871_v50 = vld [vmem:[%s950_s0 + $0x18] ss:$28 sps:$4 sm:$0xff]   ;;  %v864_v53 = vld [vmem:[#allocation2 + $0x108] sm:$0xff]   ;;  %v865_v54 = vld [vmem:[#allocation2 + $0x140] sm:$0xff]  }
  0x1f   :  { %v862_v51 = vld [vmem:[#allocation2 + $0x110] sm:$0xff]   ;;  %v866_v55 = vld [vmem:[#allocation2 + $0x100] sm:$0xff]  }
  0x20   :  { %743 = vmatpush3.bf16.msra.mxu0 %v831_v18  ;;  %v868_v56 = vld [vmem:[%s950_s0 + $0x10] ss:$28 sps:$4 sm:$0xff]  }
  0x21   :  { %765 = vmatpush3.bf16.msra.mxu1 %v832_v19  ;;  %744 = vmatprep.subr.bf16.mxu0 %v833_v20 }
  0x22   :  { %766 = vmatprep.subr.bf16.mxu1 %v834_v21 }
  0x24   :  { %745 = vmatpush3.bf16.msra.mxu0 %v835_v22 }
  0x25   :  { %767 = vmatpush3.bf16.msra.mxu1 %v836_v23  ;;  %746 = vmatprep.subr.bf16.mxu0 %v837_v24 }
  0x26   :  { %768 = vmatprep.subr.bf16.mxu1 %v838_v25 }
  0x28   :  { %747 = vmatpush3.bf16.msra.mxu0 %v839_v26 }
  0x29   :  { %769 = vmatpush3.bf16.msra.mxu1 %v840_v27  ;;  %748 = vmatprep.subr.bf16.mxu0 %v841_v28 }
  0x2a   :  { %770 = vmatprep.subr.bf16.mxu1 %v842_v29 }
  0x2c   :  { %749 = vmatpush3.bf16.msra.mxu0 %v843_v30 }
  0x2d   :  { %771 = vmatpush3.bf16.msra.mxu1 %v844_v31  ;;  %778 = vmatprep.subr.bf16.mxu0 %v851_v37 }
  0x2e   :  { %802 = vmatprep.subr.bf16.mxu1 %v903_v36 }
  0x2f   :  { %499 = vmatmul.mubr.bf16.vlgmr.msra.gmra.mxu0 %v845_v32 }
  0x30   :  { %540 = vmatmul.mubr.bf16.vlgmr.msra.gmra.mxu1 %v848_v34  ;;  %779 = vmatpush3.bf16.msra.mxu0 %v852_v38 }
  0x31   :  { %804 = vmatprep.mubr.msk.bf16.mxu1 %vm904_vm0, %v903_v36  ;;  %780 = vmatprep.subr.bf16.mxu0 %v853_v39 }
  0x32   :  { %803 = vmatpush3.bf16.msra.mxu1 %v867_v48  ;;  %580 = vmatprep.mubr.bf16.mxu0 %v870_v49 }
  0x34   :  { %781 = vmatpush3.bf16.msra.mxu0 %v854_v40 }
  0x35   :  { %782 = vmatprep.subr.bf16.mxu0 %v855_v41 }
  0x38   :  { %783 = vmatpush3.bf16.msra.mxu0 %v856_v42  ;;  %805 = vmatmul.mubr.msk.bf16.vlgmr.msra.gmra.mxu1 %vm462_vm1, %v871_v50 }
  0x39   :  { %784 = vmatprep.subr.bf16.mxu0 %v857_v43 }
  0x3c   :  { %785 = vmatpush3.bf16.msra.mxu0 %v858_v44 }
  0x3d   :  { %786 = vmatprep.subr.bf16.mxu0 %v859_v45 }
  0x40   :  { %787 = vmatpush3.bf16.msra.mxu0 %v860_v46 }
  0x41   :  { %788 = vmatprep.subr.bf16.mxu0 %v861_v47 }
  0x44   :  { %789 = vmatpush3.bf16.msra.mxu0 %v862_v51 }
  0x45   :  { %790 = vmatprep.subr.bf16.mxu0 %v863_v52 }
  0x48   :  { %791 = vmatpush3.bf16.msra.mxu0 %v864_v53 }
  0x49   :  { %792 = vmatprep.subr.bf16.mxu0 %v865_v54 }
  0x4c   :  { %793 = vmatpush3.bf16.msra.mxu0 %v866_v55 }
  0x4f   :  { %581 = vmatmul.mubr.bf16.vlgmr.msra.gmra.mxu0 %v868_v56 }
  0xef   :  { %v750_v57 = vpop.f32.mrf.mxu0 }
  0xf0   :  { %v772_v58 = vpop.f32.mrf.mxu1 }
  0xf1   :  { %v751_v59 = vpop.f32.mrf.mxu0 }
  0xf2   :  { %v773_v60 = vpop.f32.mrf.mxu1  ;;  %v752_v6 = vadd.f32 %v751_v59, %v750_v57 }
  0xf3   :  { %v753_v61 = vpop.f32.mrf.mxu0  ;;  %v774_v7 = vadd.f32 %v773_v60, %v772_v58 }
  0xf4   :  { %v775_v62 = vpop.f32.mrf.mxu1 }
  0xf5   :  { %v754_v63 = vpop.f32.mrf.mxu0  ;;  %v542_v11 = vadd.f32 %v774_v7, %v752_v6 }
  0xf6   :  { %v776_v0 = vpop.f32.mrf.mxu1 }
  0xf8   :  { %v623_v1 = vpop.f32.mrf.mxu1 }
  0xfa   :  { %v806_v2 = vpop.f32.mrf.mxu1 }
  0xfc   :  { %v626_v3 = vpop.f32.mrf.mxu1 }
  0xfe   :  { %v807_v4 = vpop.f32.mrf.mxu1 }
 0x10f   :  { %v794_v8 = vpop.f32.mrf.mxu0 }
 0x111   :  { %v795_v9 = vpop.f32.mrf.mxu0 }
 0x112   :  { %v796_v12 = vadd.f32 %v795_v9, %v794_v8 }
 0x113   :  { %v797_v13 = vpop.f32.mrf.mxu0 }
 0x114   :  { %v583_v14 = vadd.f32 %v796_v12, %v542_v11 }
 0x115   :  { %v798_v15 = vpop.f32.mrf.mxu0 }
 0x116   :  { %v624_v16 = vadd.f32 %v623_v1, %v583_v14 }
 0x118   :  { %v644_v17 = vsel %vm642_vm2, %v624_v16, -inf }
 0x119   :  { %v647_v18 = vrot.slane %v644_v17, 4 }
 0x11b   :  { %v648_v19 = vmax.f32 %v644_v17, %v647_v18 }
 0x11d   :  { %v649_v20 = vrot.slane %v648_v19, 2 }
 0x11f   :  { %v650_v21 = vmax.f32 %v648_v19, %v649_v20 }
 0x121   :  { %v651_v22 = vrot.slane %v650_v21, 1 }
 0x123   :  { %v652_v23 = vmax.f32 %v650_v21, %v651_v22 }
 0x125   :  { %v653_v24 = vsub.f32 %v644_v17, %v652_v23  ;;  %v654_v25 = vsub.f32 -inf, %v652_v23 }
 0x127   :  { %v655_v26 = vmul.f32 1.442695, %v653_v24  ;;  %v657_v27 = vmul.f32 1.442695, %v654_v25 }
 0x129   :  { %872 = vpow2.f32 %v655_v26 }
 0x12a   :  { %874 = vpow2.f32 %v657_v27 }
 0x136   :  { %v873_v28 = vpop.eup %872 }
 0x137   :  { %v875_v29 = vpop.eup %874 }
 0x138   :  { %v659_v30 = vadd.f32 %v875_v29, %v873_v28 }
 0x13a   :  { %v660_v31 = vrot.slane %v659_v30, 4 }
 0x13c   :  { %v661_v32 = vadd.f32 %v660_v31, %v659_v30 }
 0x13e   :  { %v662_v33 = vrot.slane %v661_v32, 2 }
 0x140   :  { %v663_v34 = vadd.f32 %v662_v33, %v661_v32 }
 0x142   :  { %v664_v35 = vrot.slane %v663_v34, 1 }
 0x144   :  { %v665_v36 = vadd.f32 %v664_v35, %v663_v34 }
 0x146   :  { %876 = vlog2.f32 %v665_v36 }
 0x153   :  { %v877_v37 = vpop.eup %876 }
 0x154   :  { %v667_v38 = vmul.f32 0.6931472, %v877_v37 }
 0x156   :  { %v668_v39 = vsub.f32 %v653_v24, %v667_v38  ;;  %v669_v40 = vsub.f32 %v654_v25, %v667_v38 }
 0x158   :  { %670 = vst [vmem:[%s952_s2] sm:$0xff] %v668_v39  ;;  %671 = vst [vmem:[%s952_s2 + $0x8] sm:$0xff] %v669_v40 }
 0x159   :  { %676 = vsyncpa [#allocation3], 1 }

</bundles_post_ra>
